<compile_context>
chip_gen: v7x
topology: tpu7x:2x2x1
jax: 0.10.0
libtpu: 0.0.40
codegen_flags: <defaults>
</compile_context>

<pallas_src>
import functools

import jax
import jax.numpy as jnp
from jax.experimental import pallas as pl
from jax.experimental.pallas import tpu as pltpu

_HALO = 128  # lane-aligned halo width on each side; needs (k-1)*dilation <= 128


def autopad(k, p=None, d=1):
    """pad to 'same' shape outputs (mirrors the PyTorch helper)."""
    if d > 1:
        k = d * (k - 1) + 1
    if p is None:
        p = k // 2
    return p


def _conv_bn_silu_kernel(x_ref, left_ref, right_ref, w_ref, bias_ref, o_ref,
                         win_ref, *, k, stride, dilation, pad, l_total):
    """One (L-tile, batch) grid step.

    x_ref:     (1, C1, TLS)        main input window, cols [t*TLS, (t+1)*TLS)
    left_ref:  (1, C1, 128)        left halo,  cols [t*TLS-128, t*TLS)
    right_ref: (1, C1, 128)        right halo, cols [(t+1)*TLS, +128)
    w_ref:     (K, C2, C1)         weights with the BN scale folded in
    bias_ref:  (C2, 1)             folded BN bias (f32)
    o_ref:     (1, C2, TL)         lane-dense output tile (NCL layout)
    win_ref:   (C1, 128+TLS+128)   VMEM scratch: contiguous window in the
                                   compute dtype, zero-padded at sequence edges.
    Window column c corresponds to global input column t*TLS - 128 + c.
    """
    t = pl.program_id(0)
    c1 = x_ref.shape[1]
    tls = x_ref.shape[2]
    tl = o_ref.shape[2]
    w_win = win_ref.shape[1]
    cdt = win_ref.dtype

    # ---- assemble the contiguous window (single in-VMEM copy, cast on the fly)
    win_ref[:, _HALO:_HALO + tls] = x_ref[0].astype(cdt)
    win_ref[:, _HALO + tls:] = right_ref[0].astype(cdt)

    @pl.when(t == 0)
    def _():
        # Left 'same' padding handled here instead of a wrapper-side jnp.pad.
        win_ref[:, :_HALO] = jnp.zeros((c1, _HALO), cdt)

    @pl.when(t > 0)
    def _():
        win_ref[:, :_HALO] = left_ref[0].astype(cdt)

    # Right 'same' padding / ragged tail: zero every window column whose global
    # input index is >= L.  Only boundary tiles take this branch.
    valid = (l_total + _HALO) - t * tls

    @pl.when(valid < w_win)
    def _():
        col = jax.lax.broadcasted_iota(jnp.int32, (c1, w_win), 1)
        w_all = win_ref[...]
        win_ref[...] = jnp.where(col < valid, w_all, jnp.zeros_like(w_all))

    # ---- K accumulating MXU matmuls; taps read straight from the window ref --
    if stride == 1:
        acc = None
        for j in range(k):  # static unroll over taps
            off = _HALO - pad + j * dilation
            part = jnp.dot(w_ref[j], win_ref[:, pl.ds(off, tl)],
                           preferred_element_type=jnp.float32)
            acc = part if acc is None else acc + part
    else:
        # TODO(synk): replace with a lane-strided ref read (pl.ds(..., stride=s))
        # once lane-axis strided loads are dependable in Mosaic; for now compute
        # the stride-1 conv over TL*stride positions and subsample with one extra
        # MXU matmul against a 0/1 selection matrix (always lowers, costs ~s x).
        width = tl * stride
        acc_full = None
        for j in range(k):
            off = _HALO - pad + j * dilation
            part = jnp.dot(w_ref[j], win_ref[:, pl.ds(off, width)],
                           preferred_element_type=jnp.float32)
            acc_full = part if acc_full is None else acc_full + part
        rows = jax.lax.broadcasted_iota(jnp.int32, (width, tl), 0)
        cols = jax.lax.broadcasted_iota(jnp.int32, (width, tl), 1)
        sel = (rows == cols * stride).astype(jnp.float32)
        acc = jnp.dot(acc_full, sel, preferred_element_type=jnp.float32)

    # ---- folded BatchNorm bias + SiLU epilogue --------------------------------
    # TODO(synk): on v6e/v7x a bf16 sigmoid can relieve the EUP slot; kept f32
    # so the same kernel is correct/fast on v5e (no bf16 EUP there).
    y = acc + bias_ref[...]
    y = y * jax.nn.sigmoid(y)
    o_ref[0] = y.astype(o_ref.dtype)


def _vmem_bytes():
    try:
        return int(pltpu.get_tpu_info().vmem_capacity_bytes)
    except Exception:
        return 64 * 1024 * 1024  # v7x per-core size; safe lower bound


def _pick_tile_l(c1, c2, k, stride, l_out, x_bytes, c_bytes, out_bytes, budget):
    """Largest output L tile (multiple of 128) whose working set fits `budget`."""
    fixed = (2 * k * c2 * c1 * c_bytes          # weights (double-buffered)
             + 2 * c2 * 4                       # bias
             + 4 * c1 * _HALO * x_bytes         # two halo blocks, double-buffered
             + 2 * _HALO * c1 * c_bytes         # halo part of the window scratch
             + (2 << 20))                       # misc temps / semaphores headroom
    per_col = (2 * c1 * stride * x_bytes        # main input block, double-buffered
               + c1 * stride * c_bytes          # window scratch
               + 2 * c2 * out_bytes             # output block, double-buffered
               + 2 * c2 * 4                     # f32 accumulator + SiLU temps
               + 2 * c1 * c_bytes)              # tap operand temporaries
    avail = max(budget - fixed, 1 << 20)
    tl = int(avail // max(per_col, 1))
    tl = max(128, (tl // 128) * 128)
    tl = min(tl, 8192)
    if stride > 1:
        tl = min(tl, 512)   # keep the stride-subsample selection matrix small
    tl = min(tl, int(pl.cdiv(l_out, 128)) * 128)
    return int(tl)


def conv_bn_silu(x_ncl, w_oik, gamma, beta, running_mean, running_var, *,
                 stride=1, dilation=1, padding=None, eps=1e-5,
                 compute_dtype=jnp.bfloat16, out_dtype=None, tile_l=None):
    """Fused Conv1d(bias=False) + BatchNorm1d(eval) + SiLU.

    x_ncl: (N, C1, L), w_oik: (C2, C1, K)  ->  (N, C2, L_out) in `out_dtype`
    (defaults to x_ncl.dtype).  x is read straight from HBM in its own dtype
    and cast to `compute_dtype` inside the kernel; no padded / pre-cast copy
    of x is materialized in HBM.
    """
    n, c1, l = x_ncl.shape
    c2, c1w, k = w_oik.shape
    assert c1w == c1, (c1w, c1)
    p = autopad(k, padding, dilation)
    assert (k - 1) * dilation <= _HALO, "receptive field too large for halo block"
    assert p <= _HALO, "padding too large for halo block"
    l_out = (l + 2 * p - dilation * (k - 1) - 1) // stride + 1
    assert l_out > 0
    out_dtype = x_ncl.dtype if out_dtype is None else out_dtype

    x_bytes = jnp.dtype(x_ncl.dtype).itemsize
    c_bytes = jnp.dtype(compute_dtype).itemsize
    o_bytes = jnp.dtype(out_dtype).itemsize
    vmem_cap = _vmem_bytes()
    if tile_l is None:
        tile_l = _pick_tile_l(c1, c2, k, stride, l_out, x_bytes, c_bytes,
                              o_bytes, budget=int(vmem_cap * 0.6))
    tile_l = max(128, int(pl.cdiv(int(tile_l), 128)) * 128)
    tls = tile_l * stride                 # input columns per tile (mult. of 128)
    n_t = int(pl.cdiv(l_out, tile_l))
    hs = tls // _HALO                     # main-block width in 128-column units
    w_win = tls + 2 * _HALO

    # Fold BN (eval mode) into the conv: scale -> weights, shift -> bias.
    scale = (gamma / jnp.sqrt(running_var + eps)).astype(jnp.float32)       # (C2,)
    bias = (beta.astype(jnp.float32)
            - running_mean.astype(jnp.float32) * scale).reshape(c2, 1)
    w_koc = (jnp.transpose(w_oik, (2, 0, 1)).astype(jnp.float32)
             * scale[None, :, None]).astype(compute_dtype)                  # (K,C2,C1)

    # In-bounds clamps for edge tiles (clamped fetches are zero-masked in-kernel,
    # so they are never consumed as real input data).
    max_main = max((l - 1) // tls, 0)
    max_halo = max((l - 1) // _HALO, 0)

    kernel = functools.partial(_conv_bn_silu_kernel, k=k, stride=stride,
                               dilation=dilation, pad=p, l_total=l)

    cost = pl.CostEstimate(
        flops=2 * n * l_out * k * c1 * c2
              + (2 * n * l_out * tls * c2 if stride > 1 else 0),
        transcendentals=n * l_out * c2,
        bytes_accessed=n * c1 * (l + n_t * 2 * _HALO) * x_bytes
                       + k * c2 * c1 * c_bytes + n * c2 * l_out * o_bytes)

    out = pl.pallas_call(
        kernel,
        out_shape=jax.ShapeDtypeStruct((n, c2, l_out), out_dtype),
        grid_spec=pltpu.PrefetchScalarGridSpec(
            num_scalar_prefetch=0,
            # L-tile axis first so megacore sharding keeps both TensorCores
            # busy even when N == 1 (common inference case).
            grid=(n_t, n),
            in_specs=[
                pl.BlockSpec((1, c1, tls),
                             lambda t, b: (b, 0, jnp.minimum(t, max_main))),
                pl.BlockSpec((1, c1, _HALO),
                             lambda t, b: (b, 0, jnp.maximum(t * hs - 1, 0))),
                pl.BlockSpec((1, c1, _HALO),
                             lambda t, b: (b, 0, jnp.minimum((t + 1) * hs,
                                                             max_halo))),
                pl.BlockSpec((k, c2, c1), lambda t, b: (0, 0, 0)),
                pl.BlockSpec((c2, 1), lambda t, b: (0, 0)),
            ],
            out_specs=pl.BlockSpec((1, c2, tile_l), lambda t, b: (b, 0, t)),
            scratch_shapes=[pltpu.VMEM((c1, w_win), compute_dtype)],
        ),
        compiler_params=pltpu.CompilerParams(
            dimension_semantics=("parallel", "parallel"),
            vmem_limit_bytes=int(min(vmem_cap * 0.85, 100 * 1024 * 1024))),
        cost_estimate=cost,
    )(x_ncl, x_ncl, x_ncl, w_koc, bias)
    return out


def _reference(x_ncl, w_oik, gamma, beta, running_mean, running_var, *,
               stride=1, dilation=1, padding=None, eps=1e-5):
    k = w_oik.shape[2]
    p = autopad(k, padding, dilation)
    y = jax.lax.conv_general_dilated(
        x_ncl.astype(jnp.float32), w_oik.astype(jnp.float32),
        window_strides=(stride,), padding=[(p, p)], rhs_dilation=(dilation,),
        dimension_numbers=('NCH', 'OIH', 'NCH'))
    scale = gamma / jnp.sqrt(running_var + eps)
    bias = beta - running_mean * scale
    y = y * scale[None, :, None] + bias[None, :, None]
    return y * jax.nn.sigmoid(y)


if __name__ == "__main__":
    key = jax.random.PRNGKey(0)
    kx, kw, kg, kb, km, kv, kx2, kx3 = jax.random.split(key, 8)

    N, C1, C2, K = 2, 4, 8, 3
    w = jax.random.normal(kw, (C2, C1, K), jnp.float32) * 0.1
    gamma = jax.random.uniform(kg, (C2,), jnp.float32, 0.5, 1.5)
    beta = jax.random.normal(kb, (C2,), jnp.float32) * 0.1
    rmean = jax.random.normal(km, (C2,), jnp.float32) * 0.1
    rvar = jax.random.uniform(kv, (C2,), jnp.float32, 0.5, 1.5)

    def check(out, ref, atol, rtol, shape):
        assert out.shape == shape, (out.shape, shape)
        o32 = out.astype(jnp.float32)
        err = float(jnp.max(jnp.abs(o32 - ref)))
        assert jnp.allclose(o32, ref, atol=atol, rtol=rtol), err

    # 1) k=3, s=1, d=1, single tile, f32 compute/output.
    L = 16
    x = jax.random.normal(kx, (N, C1, L), jnp.float32)
    out = jax.block_until_ready(conv_bn_silu(x, w, gamma, beta, rmean, rvar,
                                             compute_dtype=jnp.float32))
    check(out, _reference(x, w, gamma, beta, rmean, rvar), 2e-3, 2e-3, (N, C2, L))

    # 2) long L, bf16 compute + bf16 output, forced small tiles (multi-tile halo).
    L2 = 300
    x2 = jax.random.normal(kx2, (N, C1, L2), jnp.float32)
    out2 = jax.block_until_ready(conv_bn_silu(x2, w, gamma, beta, rmean, rvar,
                                              compute_dtype=jnp.bfloat16,
                                              out_dtype=jnp.bfloat16, tile_l=128))
    check(out2, _reference(x2, w, gamma, beta, rmean, rvar),
          3e-2, 3e-2, (N, C2, L2))

    # 3) dilation=2, multi-tile, f32.
    L3 = 200
    x3 = jax.random.normal(kx3, (N, C1, L3), jnp.float32)
    out3 = jax.block_until_ready(conv_bn_silu(x3, w, gamma, beta, rmean, rvar,
                                              dilation=2,
                                              compute_dtype=jnp.float32,
                                              tile_l=128))
    check(out3, _reference(x3, w, gamma, beta, rmean, rvar, dilation=2),
          2e-3, 2e-3, (N, C2, L3))

    # 4) stride=2, multi-tile with ragged last tile, f32.
    out4 = jax.block_until_ready(conv_bn_silu(x2, w, gamma, beta, rmean, rvar,
                                              stride=2,
                                              compute_dtype=jnp.float32,
                                              tile_l=128))
    l_out4 = (L2 + 2 * 1 - 2 - 1) // 2 + 1
    check(out4, _reference(x2, w, gamma, beta, rmean, rvar, stride=2),
          2e-3, 2e-3, (N, C2, l_out4))

    # 5) k=1 pointwise conv (module default), multi-tile, f32.
    w1 = w[:, :, :1]
    out5 = jax.block_until_ready(conv_bn_silu(x3, w1, gamma, beta, rmean, rvar,
                                              compute_dtype=jnp.float32,
                                              tile_l=128))
    check(out5, _reference(x3, w1, gamma, beta, rmean, rvar),
          2e-3, 2e-3, (N, C2, L3))

    print("KERNEL_OK")
</pallas_src>

<mosaic_0001>
module attributes {stable_mosaic.version = 11 : i64} {
  func.func @_conv_bn_silu_kernel(%arg0: i32, %arg1: i32, %arg2: memref<1x4x128xf32, #tpu.memory_space<vmem>>, %arg3: memref<1x4x128xf32, #tpu.memory_space<vmem>>, %arg4: memref<1x4x128xf32, #tpu.memory_space<vmem>>, %arg5: memref<3x8x4xf32, #tpu.memory_space<vmem>>, %arg6: memref<8x1xf32, #tpu.memory_space<vmem>>, %arg7: memref<1x8x128xf32, #tpu.memory_space<vmem>>, %arg8: memref<4x384xf32, #tpu.memory_space<vmem>>) attributes {dimension_semantics = [#tpu.dimension_semantics<parallel>, #tpu.dimension_semantics<parallel>], iteration_bounds = array<i64: 1, 2>, scalar_prefetch = 0 : i64, scratch_operands = 1 : i64, tpu.core_type = #tpu.core_type<tc>, window_params = [{transform_indices = @transform_0, window_bounds = array<i64: 1, 4, 128>}, {transform_indices = @transform_1, window_bounds = array<i64: 1, 4, 128>}, {transform_indices = @transform_2, window_bounds = array<i64: 1, 4, 128>}, {pipeline_mode = #tpu.pipeline_mode<synchronous>, transform_indices = @transform_3, window_bounds = array<i64: 3, 8, 4>}, {pipeline_mode = #tpu.pipeline_mode<synchronous>, transform_indices = @transform_4, window_bounds = array<i64: 8, 1>}, {transform_indices = @transform_5, window_bounds = array<i64: 1, 8, 128>}]} {
    %c0 = arith.constant 0 : index
    %c0_0 = arith.constant 0 : index
    %c0_1 = arith.constant 0 : index
    %0 = vector.load %arg2[%c0, %c0_0, %c0_1] : memref<1x4x128xf32, #tpu.memory_space<vmem>>, vector<1x4x128xf32>
    %1 = vector.shape_cast %0 : vector<1x4x128xf32> to vector<4x128xf32>
    %c0_2 = arith.constant 0 : index
    %c128 = arith.constant 128 : index
    %2 = vector.load %arg8[%c0_2, %c128] : memref<4x384xf32, #tpu.memory_space<vmem>>, vector<4x128xf32>
    tpu.vector_store %arg8[%c0_2, %c128], %1 {strides = array<i32>} : memref<4x384xf32, #tpu.memory_space<vmem>>, vector<4x128xf32>,
    %c0_3 = arith.constant 0 : index
    %c0_4 = arith.constant 0 : index
    %c0_5 = arith.constant 0 : index
    %3 = vector.load %arg4[%c0_3, %c0_4, %c0_5] : memref<1x4x128xf32, #tpu.memory_space<vmem>>, vector<1x4x128xf32>
    %4 = vector.shape_cast %3 : vector<1x4x128xf32> to vector<4x128xf32>
    %c0_6 = arith.constant 0 : index
    %c256 = arith.constant 256 : index
    %5 = vector.load %arg8[%c0_6, %c256] : memref<4x384xf32, #tpu.memory_space<vmem>>, vector<4x128xf32>
    tpu.vector_store %arg8[%c0_6, %c256], %4 {strides = array<i32>} : memref<4x384xf32, #tpu.memory_space<vmem>>, vector<4x128xf32>,
    %c0_i32 = arith.constant 0 : i32
    %6 = arith.cmpi eq, %arg0, %c0_i32 : i32
    %7 = arith.extui %6 : i1 to i32
    %c0_i32_7 = arith.constant 0 : i32
    %8 = arith.cmpi ne, %7, %c0_i32_7 : i32
    scf.if %8 {
      %cst_30 = arith.constant 0.000000e+00 : f32
      %43 = vector.broadcast %cst_30 : f32 to vector<4x128xf32>
      %c0_31 = arith.constant 0 : index
      %c0_32 = arith.constant 0 : index
      %44 = vector.load %arg8[%c0_31, %c0_32] : memref<4x384xf32, #tpu.memory_space<vmem>>, vector<4x128xf32>
      tpu.vector_store %arg8[%c0_31, %c0_32], %43 {strides = array<i32>} : memref<4x384xf32, #tpu.memory_space<vmem>>, vector<4x128xf32>,
    } else {
    }
    %c0_i32_8 = arith.constant 0 : i32
    %9 = arith.cmpi sgt, %arg0, %c0_i32_8 : i32
    %10 = arith.extui %9 : i1 to i32
    %c0_i32_9 = arith.constant 0 : i32
    %11 = arith.cmpi ne, %10, %c0_i32_9 : i32
    scf.if %11 {
      %c0_30 = arith.constant 0 : index
      %c0_31 = arith.constant 0 : index
      %c0_32 = arith.constant 0 : index
      %43 = vector.load %arg3[%c0_30, %c0_31, %c0_32] : memref<1x4x128xf32, #tpu.memory_space<vmem>>, vector<1x4x128xf32>
      %44 = vector.shape_cast %43 : vector<1x4x128xf32> to vector<4x128xf32>
      %c0_33 = arith.constant 0 : index
      %c0_34 = arith.constant 0 : index
      %45 = vector.load %arg8[%c0_33, %c0_34] : memref<4x384xf32, #tpu.memory_space<vmem>>, vector<4x128xf32>
      tpu.vector_store %arg8[%c0_33, %c0_34], %44 {strides = array<i32>} : memref<4x384xf32, #tpu.memory_space<vmem>>, vector<4x128xf32>,
    } else {
    }
    %c128_i32 = arith.constant 128 : i32
    %12 = arith.muli %arg0, %c128_i32 : i32
    %c144_i32 = arith.constant 144 : i32
    %13 = arith.subi %c144_i32, %12 : i32
    %c384_i32 = arith.constant 384 : i32
    %14 = arith.cmpi slt, %13, %c384_i32 : i32
    %15 = arith.extui %14 : i1 to i32
    %c0_i32_10 = arith.constant 0 : i32
    %16 = arith.cmpi ne, %15, %c0_i32_10 : i32
    scf.if %16 {
      %43 = tpu.iota {dimensions = array<i32: 1>} : vector<4x384xi32>
      %c0_30 = arith.constant 0 : index
      %c0_31 = arith.constant 0 : index
      %44 = vector.load %arg8[%c0_30, %c0_31] : memref<4x384xf32, #tpu.memory_space<vmem>>, vector<4x384xf32>
      %45 = vector.broadcast %13 : i32 to vector<4x384xi32>
      %46 = arith.cmpi slt, %43, %45 : vector<4x384xi32>
      %cst_32 = arith.constant 0.000000e+00 : f32
      %47 = vector.broadcast %cst_32 : f32 to vector<4x384xf32>
      %48 = arith.select %46, %44, %47 : vector<4x384xi1>, vector<4x384xf32>
      %c0_33 = arith.constant 0 : index
      %c0_34 = arith.constant 0 : index
      %49 = vector.load %arg8[%c0_33, %c0_34] : memref<4x384xf32, #tpu.memory_space<vmem>>, vector<4x384xf32>
      tpu.vector_store %arg8[%c0_33, %c0_34], %48 {strides = array<i32>} : memref<4x384xf32, #tpu.memory_space<vmem>>, vector<4x384xf32>,
    } else {
    }
    %c0_11 = arith.constant 0 : index
    %c0_12 = arith.constant 0 : index
    %c0_13 = arith.constant 0 : index
    %17 = vector.load %arg5[%c0_11, %c0_12, %c0_13] : memref<3x8x4xf32, #tpu.memory_space<vmem>>, vector<1x8x4xf32>
    %18 = vector.shape_cast %17 : vector<1x8x4xf32> to vector<8x4xf32>
    %c0_14 = arith.constant 0 : index
    %c127 = arith.constant 127 : index
    %19 = vector.load %arg8[%c0_14, %c127] : memref<4x384xf32, #tpu.memory_space<vmem>>, vector<4x128xf32>
    %cst = arith.constant dense<0.000000e+00> : vector<8x128xf32>
    %20 = tpu.matmul %18, %19, %cst {dimension_numbers = #tpu.dot_dimension_numbers<[1], [0], [0], [1], [0, 0, 1, 1], [], []>} : vector<8x4xf32>, vector<4x128xf32>, vector<8x128xf32> -> vector<8x128xf32>
    %c1 = arith.constant 1 : index
    %c0_15 = arith.constant 0 : index
    %c0_16 = arith.constant 0 : index
    %21 = vector.load %arg5[%c1, %c0_15, %c0_16] : memref<3x8x4xf32, #tpu.memory_space<vmem>>, vector<1x8x4xf32>
    %22 = vector.shape_cast %21 : vector<1x8x4xf32> to vector<8x4xf32>
    %c0_17 = arith.constant 0 : index
    %c128_18 = arith.constant 128 : index
    %23 = vector.load %arg8[%c0_17, %c128_18] : memref<4x384xf32, #tpu.memory_space<vmem>>, vector<4x128xf32>
    %cst_19 = arith.constant dense<0.000000e+00> : vector<8x128xf32>
    %24 = tpu.matmul %22, %23, %cst_19 {dimension_numbers = #tpu.dot_dimension_numbers<[1], [0], [0], [1], [0, 0, 1, 1], [], []>} : vector<8x4xf32>, vector<4x128xf32>, vector<8x128xf32> -> vector<8x128xf32>
    %25 = arith.addf %20, %24 : vector<8x128xf32>
    %c2 = arith.constant 2 : index
    %c0_20 = arith.constant 0 : index
    %c0_21 = arith.constant 0 : index
    %26 = vector.load %arg5[%c2, %c0_20, %c0_21] : memref<3x8x4xf32, #tpu.memory_space<vmem>>, vector<1x8x4xf32>
    %27 = vector.shape_cast %26 : vector<1x8x4xf32> to vector<8x4xf32>
    %c0_22 = arith.constant 0 : index
    %c129 = arith.constant 129 : index
    %28 = vector.load %arg8[%c0_22, %c129] : memref<4x384xf32, #tpu.memory_space<vmem>>, vector<4x128xf32>
    %cst_23 = arith.constant dense<0.000000e+00> : vector<8x128xf32>
    %29 = tpu.matmul %27, %28, %cst_23 {dimension_numbers = #tpu.dot_dimension_numbers<[1], [0], [0], [1], [0, 0, 1, 1], [], []>} : vector<8x4xf32>, vector<4x128xf32>, vector<8x128xf32> -> vector<8x128xf32>
    %30 = arith.addf %25, %29 : vector<8x128xf32>
    %c0_24 = arith.constant 0 : index
    %c0_25 = arith.constant 0 : index
    %31 = vector.load %arg6[%c0_24, %c0_25] : memref<8x1xf32, #tpu.memory_space<vmem>>, vector<8x1xf32>
    %32 = vector.broadcast %31 : vector<8x1xf32> to vector<8x128xf32>
    %33 = arith.addf %30, %32 : vector<8x128xf32>
    %34 = arith.negf %33 : vector<8x128xf32>
    %35 = math.exp %34 : vector<8x128xf32>
    %cst_26 = arith.constant 1.000000e+00 : f32
    %36 = vector.broadcast %cst_26 : f32 to vector<8x128xf32>
    %37 = arith.addf %36, %35 : vector<8x128xf32>
    %38 = arith.divf %36, %37 : vector<8x128xf32>
    %39 = arith.mulf %33, %38 : vector<8x128xf32>
    %c0_27 = arith.constant 0 : index
    %c0_28 = arith.constant 0 : index
    %c0_29 = arith.constant 0 : index
    %40 = vector.load %arg7[%c0_27, %c0_28, %c0_29] : memref<1x8x128xf32, #tpu.memory_space<vmem>>, vector<1x8x128xf32>
    %41 = vector.shape_cast %40 : vector<1x8x128xf32> to vector<8x128xf32>
    %42 = vector.shape_cast %39 : vector<8x128xf32> to vector<1x8x128xf32>
    tpu.vector_store %arg7[%c0_27, %c0_28, %c0_29], %42 {strides = array<i32>} : memref<1x8x128xf32, #tpu.memory_space<vmem>>, vector<1x8x128xf32>,
    return
  }
  func.func @transform_0(%arg0: i32, %arg1: i32) -> (i32, i32, i32) {
    %c0_i32 = arith.constant 0 : i32
    %0 = arith.minsi %arg0, %c0_i32 : i32
    %c0_i32_0 = arith.constant 0 : i32
    %c0_i32_1 = arith.constant 0 : i32
    return %arg1, %c0_i32_0, %0 : i32, i32, i32
  }
  func.func @transform_1(%arg0: i32, %arg1: i32) -> (i32, i32, i32) {
    %c1_i32 = arith.constant 1 : i32
    %0 = arith.muli %arg0, %c1_i32 : i32
    %c1_i32_0 = arith.constant 1 : i32
    %1 = arith.subi %0, %c1_i32_0 : i32
    %c0_i32 = arith.constant 0 : i32
    %2 = arith.maxsi %1, %c0_i32 : i32
    %c0_i32_1 = arith.constant 0 : i32
    %c0_i32_2 = arith.constant 0 : i32
    return %arg1, %c0_i32_1, %2 : i32, i32, i32
  }
  func.func @transform_2(%arg0: i32, %arg1: i32) -> (i32, i32, i32) {
    %c1_i32 = arith.constant 1 : i32
    %0 = arith.addi %arg0, %c1_i32 : i32
    %c1_i32_0 = arith.constant 1 : i32
    %1 = arith.muli %0, %c1_i32_0 : i32
    %c0_i32 = arith.constant 0 : i32
    %2 = arith.minsi %1, %c0_i32 : i32
    %c0_i32_1 = arith.constant 0 : i32
    %c0_i32_2 = arith.constant 0 : i32
    return %arg1, %c0_i32_1, %2 : i32, i32, i32
  }
  func.func @transform_3(%arg0: i32, %arg1: i32) -> (i32, i32, i32) {
    %c0_i32 = arith.constant 0 : i32
    %c0_i32_0 = arith.constant 0 : i32
    %c0_i32_1 = arith.constant 0 : i32
    %c0_i32_2 = arith.constant 0 : i32
    return %c0_i32, %c0_i32_0, %c0_i32_1 : i32, i32, i32
  }
  func.func @transform_4(%arg0: i32, %arg1: i32) -> (i32, i32) {
    %c0_i32 = arith.constant 0 : i32
    %c0_i32_0 = arith.constant 0 : i32
    %c0_i32_1 = arith.constant 0 : i32
    return %c0_i32, %c0_i32_0 : i32, i32
  }
  func.func @transform_5(%arg0: i32, %arg1: i32) -> (i32, i32, i32) {
    %c0_i32 = arith.constant 0 : i32
    %c0_i32_0 = arith.constant 0 : i32
    return %arg1, %c0_i32, %arg0 : i32, i32, i32
  }
}

</mosaic_0001>

<bundles_post_ra>
// kernel: tpu_custom_call.1
= control target key start
LH: loop header
LB: loop body
LE: loop exit
PB: predicated region body
PF: predicated region fallthrough
CT: control target
= control target key end

     0   :  { %10 = vsyncpa [#allocation4], 0  ;;  %s1147_s0 = inlined_call_operand.vmem [shape: f32[2,4,16], index: 0, kind: input, shape index: {}]   ;;  %s1148_s1 = inlined_call_operand.vmem [shape: f32[2,4,16], index: 1, kind: input, shape index: {}]   ;;  %s1149_s2 = inlined_call_operand.vmem [shape: f32[2,4,16], index: 2, kind: input, shape index: {}]   ;;  %s1150_s3 = inlined_call_operand.vmem [shape: f32[3,8,4], index: 3, kind: input, shape index: {}]   ;;  %s1151_s4 = inlined_call_operand.vmem [shape: f32[8,1], index: 4, kind: input, shape index: {}]   ;;  %s1152_s5 = inlined_call_operand.hbm [shape: f32[2,8,16], index: 5, kind: output, shape index: {}]  }
   0x1   :  { %12 = vsyncpa [#allocation4 + $0x1], 0  ;;  %s1011_s18 = smov 0   ;;  %s1013_s19 = smov 0  }
   0x2   :  { %s1015_s20 = smov 0   ;;  %s1017_s1 = smov 0  }
   0x3   :  { %s1019_s21 = smov 0   ;;  %s1021_s22 = smov 0  }
   0x4 LB: > { %s784_s23 = sadd.s32 4294967295, %s973_s22   ;;  %s785_s24 = sadd.s32 4294967294, %s973_s22   ;;  %s973_s22 = sphi %s1021_s22, %s18_s22   ;;  %s969_s21 = sphi %s1019_s21, %s1159_s21   ;;  %s965_s1 = sphi %s1017_s1, %s1158_s1   ;;  %s961_s20 = sphi %s1015_s20, %s1157_s20   ;;  %s957_s19 = sphi %s1013_s19, %s1156_s19   ;;  %s953_s18 = sphi %s1011_s18, %s1155_s18  }
   0x5   : > { %s27_s25 = sadd.s32 1, %s969_s21  ;;  %s181_s26 = sadd.s32 1, %s961_s20 }
   0x6   : > { %p28_p0 = scmp.ge.s32.totalorder %s27_s25, 2  ;;  %p191_p1 = scmp.ne.s32.totalorder %s961_s20, %s957_s19 }
   0x7   : > { %p192_p2 = scmp.eq.s32.totalorder %s784_s23, 1  ;;  %p197_p3 = scmp.ne.s32.totalorder %s957_s19, %s953_s18 }
   0x8   : > { %s1161_s25 = smov (%p28_p0, %s27_s25), 0  ;;  %p198_p5 = scmp.eq.s32.totalorder %s785_s24, 1 }
   0x9   : > { %p1051_p4 = por %p192_p2, %p191_p1  ;;  %s176_s28 = ssub.s32 %s969_s21, %s1161_s25 }
   0xa   : > { %p788_p6 = scmp.ge.s32.totalorder %s973_s22, 1  ;;  %p179_p7 = scmp.eq.s32.totalorder %s176_s28, 0 }
   0xb   : > { %p1058_p8 = por %p198_p5, %p197_p3  ;;  %p268_p9 = scmp.lt.s32.totalorder %s973_s22, 3 }
   0xc   : > { %s1064_s30 = scalar_select %p179_p7, %s961_s20, %s181_s26  }
   0xd   : > { %p269_p10 = pnand %p788_p6, %p268_p9 }
   0xe   : > { %p322_p11 = scmp.lt.s32.totalorder (!%p269_p10), %s965_s1, 1  ;;  %v975_v0 = vmov (!%p269_p10), 0.0   ;;  %v378_v1 = vlaneseq (!%p269_p10)  ;;  %vm976_vm1 = vmmov (!%p269_p10), 0   ;;  %s977_s14 = smov (!%p269_p10), 1   ;;  %v978_v11 = vmov (!%p269_p10), 0   ;;  %v793_v12 = vld [vmem:[%s1150_s3 + $0x8] sm:$0xff] (!%p269_p10) }
   0xf   : > { %272 = sbr.rel (%p269_p10) target bundleno = 427 (0x1ab), region = 40  ;;  %365 = vst [vmem:[#allocation2] sm:$0xf] (!%p269_p10), %v975_v0  ;;  %812 = vmatprep.subr.mxu0 (!%p269_p10), %v975_v0  ;;  %817 = vmatprep.subr.mxu1 (!%p269_p10), %v975_v0  ;;  %vm409_vm2 = vcmask (!%p269_p10), 1043456   ;;  %vm405_vm3 = vcmask (!%p269_p10), 31744   ;;  %v653_v15 = vld [vmem:[%s1151_s4] sm:$0xff] (!%p269_p10) }
  0x10   : > { %v379_v4 = vand.u32 (!%p269_p10), 127, %v378_v1  ;;  %814 = vmatprep.mubr.msk.f32.mxu0 (!%p269_p10), %vm976_vm1, %v975_v0  ;;  %819 = vmatprep.mubr.msk.f32.mxu1 (!%p269_p10), %vm976_vm1, %v975_v0  ;;  %s979_s24 = smov (!%p269_p10), 127   ;;  %vm489_vm4 = vcmask (!%p269_p10), 7168   ;;  %v400_v19 = vld [vmem:[%s1150_s3] sm:$0xff] (!%p269_p10)  ;;  %vm575_vm5 = vcmask (!%p269_p10), 1039360   ;;  %v798_v23 = vld [vmem:[%s1150_s3 + $0x10] sm:$0xff] (!%p269_p10) }
  0x11   : > { %887 = vset.pattern.permute.xlu0 (!%p269_p10), %v978_v11  ;;  %s317_s8 = sand.u32 (!%p269_p10), 1, %s957_s19  }
  0x12   : > { %v380_v5 = vadd.s32 (!%p269_p10), 128, %v379_v4  ;;  %s789_s9 = sshll.u32 (!%p269_p10), %s317_s8, 3  ;;  %s669_s16 = scalar_lea.sflag (!%p269_p10), [#allocation4], %s317_s8 }
  0x13   : > { %s319_s11 = scalar_lea.vmem (!%p269_p10), [#allocation3], %s789_s9 }
  0x14   : > { %vm386_vm0 = vcmp.lt.s32.totalorder (!%p269_p10), %v380_v5, 144  ;;  %s683_s12 = sshll.u32 (!%p269_p10), %s319_s11, 4  ;;  %s1102_s12 = int_to_ptr.vmem [resolvable:$true] %s683_s12 }
  0x15   : > { %s895_s17 = scalar_lea.vmem (!%p269_p10), %s1102_s12, 128 }
  0x16   : > { %s323_s6 = scalar_select %p322_p11, %s965_s1, 1 }
  0x17   : > { %p896_p12 = scmp.ne.s32.totalorder %s1102_s12, %s895_s17 }
  0x18   : > { %s790_s7 = sshll.u32 %s323_s6, 2 }
  0x19   : > { %s328_s10 = scalar_lea.vmem %s1147_s0, %s790_s7  ;;  %s353_s13 = scalar_lea.vmem %s1149_s2, %s790_s7 }
  0x1a   : > { %v357_v2 = vld [vmem:[%s328_s10] sm:$0xf]  ;;  %s803_s10 = sshll.u32 %s965_s1, 7  ;;  %p897_p13 = pnand %p896_p12, %p1051_p4 }
  0x1b   : > { %v359_v3 = vld [vmem:[%s353_s13] sm:$0xf]  ;;  %358 = vst [vmem:[#allocation2 + $0x4] sm:$0xf] %v357_v2  ;;  %s1100_s15 = scalar_lea.hbm %s1152_s5, %s803_s10  ;;  %s980_s1 = smov [#allocation3]  }
  0x1c   : > { %360 = vst [vmem:[#allocation2 + $0x8] sm:$0xf] %v359_v3  ;;  %p898_p0 = pneg %p897_p13  ;;  %s899_s23 = sshll.u32 %s980_s1, 4  ;;  %s900_s23 = int_to_ptr.vmem [resolvable:$false] %s899_s23 }
  0x1d   : > { %399 = vst [vmem:[#allocation2 + $0x8] sm:$0xf] %v975_v0  ;;  %p902_p1 = scmp.lt.s32.totalorder %s1102_s12, %s900_s23 }
  0x22   : > { %v382_v6 = vld [vmem:[#allocation2] sm:$0xff] }
  0x23   : > { %v389_v7 = vcombine.high %v382_v6, %v382_v6 }
  0x25   : > { %v392_v8 = vsel %vm386_vm0, %v389_v7, 0.0 }
  0x26   : > { %v396_v9 = vcombine.low %v382_v6, %v392_v8  ;;  %v894_v10 = vcombine.low %v392_v8, %v392_v8 }
  0x28   : > { %398 = vst [vmem:[#allocation2] sm:$0xff] %v396_v9  ;;  %485 = vrot.lane.b32.xlu0 %v396_v9, %s977_s14 }
  0x2c   : > { %487 = vrot.lane.b32.xlu0 %v894_v10, %s977_s14 }
  0x2f   : > { %v568_v13 = vld [vmem:[#allocation2 + $0x4] sm:$0xff] }
  0x30   : > { %v404_v14 = vld [vmem:[#allocation2 + $0x4] sm:$0xf]  ;;  %571 = vrot.lane.b32.xlu1 %v568_v13, %s979_s24  ;;  %v570_v16 = vcombine.high %v568_v13, %v568_v13  ;;  %656 = vperm.xlu0 %887, %v653_v15  }
  0x31   : > { %813 = vmatpush3.msk.msra.mxu0 %vm409_vm2, %v404_v14 }
  0x32   : > { %815 = vmatmul.mubr.msk.f32.vlgmr.msra.gmra.mrb[0].mxu0 %vm405_vm3, %v793_v12  ;;  %822 = vmatprep.subr.mxu0 %v975_v0 }
  0x33   : > { %824 = vmatprep.mubr.msk.f32.mxu0 %vm976_vm1, %v975_v0 }
  0x34   : > { %573 = vrot.lane.b32.xlu1 %v570_v16, %s979_s24  ;;  %s901_s24 = scalar_lea.vmem %s900_s23, 256 }
  0x35   : > { %p903_p2 = scmp.lt.s32.totalorder %s901_s24, %s895_s17 }
  0x37   : > { %p904_p3 = por %p903_p2, %p902_p1 }
  0x39   : > { %p905_p5 = pnand %p904_p3, %p898_p0 }
  0x9a   : > { %v486_v17 = vpop.permute.xlu0 %485 }
  0x9e   : > { %v488_v18 = vpop.permute.xlu0 %487 }
  0x9f   : > { %v490_v20 = vsel %vm489_vm4, %v486_v17, %v488_v18 }
  0xa0   : > { %818 = vmatpush3.msk.msra.mxu1 %vm409_vm2, %v490_v20 }
  0xa1   : > { %820 = vmatmul.mubr.msk.f32.vlgmr.msra.gmra.mrb[0].mxu1 %vm405_vm3, %v400_v19 }
  0xa2   : > { %v572_v21 = vpop.permute.xlu1 %571 }
  0xa6   : > { %v574_v22 = vpop.permute.xlu1 %573 }
  0xa7   : > { %v576_v24 = vsel %vm575_vm5, %v572_v21, %v574_v22 }
  0xa8   : > { %823 = vmatpush3.msk.msra.mxu0 %vm409_vm2, %v576_v24 }
  0xa9   : > { %825 = vmatmul.mubr.msk.f32.vlgmr.msra.gmra.mrb[2].mxu0 %vm405_vm3, %v798_v23 }
  0xaf   : > { %v657_v31 = vpop.permute.xlu0 %656 }
 0x105   : > { %v479_v25 = vpop.f32.mrb[0].mxu0 }
 0x106   : > { %v816_v26 = vpop.f32.mrb[1].mxu0 }
 0x174   : > { %v562_v27 = vpop.f32.mrb[0].mxu1 }
 0x175   : > { %v563_v28 = vadd.f32 %v562_v27, %v479_v25  ;;  %v821_v29 = vpop.f32.mrb[1].mxu1 }
 0x17c   : > { %v648_v30 = vpop.f32.mrb[2].mxu0 }
 0x17d   : > { %v652_v32 = vadd.f32 %v648_v30, %v563_v28  ;;  %v826_v33 = vpop.f32.mrb[3].mxu0 }
 0x17f   : > { %v659_v34 = vadd.f32 %v657_v31, %v652_v32 }
 0x181   : > { %v801_v35 = vmul.f32 -1.442695, %v659_v34 }
 0x183   : > { %890 = vpow2.f32 %v801_v35 }
 0x18d   : > { %v891_v36 = vpop.eup %890 }
 0x18e   : > { %v663_v37 = vadd.f32 1.0, %v891_v36 }
 0x190   : > { %892 = vrcp.f32 %v663_v37 }
 0x19a   : > { %v893_v38 = vpop.eup %892 }
 0x19b   : > { %v666_v39 = vmul.f32 %v893_v38, %v659_v34 }
 0x19d   : > { %667 = vst [vmem:[%s319_s11] sm:$0xff] %v666_v39 }
 0x19e   : > { %908 = shalt.err (!%p905_p5)
}
 0x19f   : > { %s909_s26 = scalar_lea.hbm %s1100_s15, 128  ;;  %s913_s7 = scalar_lea.hbm %s1152_s5, 256 }
 0x1a0   : > { %p910_p6 = scmp.ne.s32.totalorder %s1100_s15, %s909_s26  ;;  %p914_p10 = scmp.lt.u32.totalorder %s1100_s15, %s1152_s5 }
 0x1a1   : > { %p915_p11 = scmp.lt.u32.totalorder %s913_s7, %s909_s26  ;;  %p917_p13 = scmp.lt.u32.totalorder %s909_s26, %s1100_s15 }
 0x1a2   : > { %p911_p7 = pnand %p910_p6, %p1051_p4 }
 0x1a3   : > { %p916_p12 = por %p915_p11, %p914_p10 }
 0x1a4   : > { %p912_p9 = pneg %p911_p7 }
 0x1a5   : > { %p918_p0 = por %p917_p13, %p916_p12 }
 0x1a7   : > { %p919_p1 = pnand %p918_p0, %p912_p9 }
 0x1a9   : > { %922 = shalt.err (!%p919_p1)
}
 0x1aa   : > { %827 = dma.vmem_to_hbm [thread:$0]  (%p1051_p4), %s1102_s12, 128, %s1100_s15, %s669_s16  }
 0x1ab PF: > { %p833_p2 = scmp.ge.s32.totalorder %s973_s22, 2  ;;  %s695_s10 = sand.u32 1, %s953_s18  }
 0x1ac   : > { %s696_s11 = scalar_lea.sflag [#allocation4], %s695_s10 }
 0x1ad   : > { %p830_p3 = pnand %p833_p2, %p1058_p8 }
 0x1af   : > { %948 = dma.done.wait (!%p830_p3), %s696_s11, 128  }
 0x1b0   : > { %950 = vsyncadd (!%p830_p3), %s696_s11, 4294967168  ;;  %s18_s22 = sadd.s32 1, %s973_s22   ;;  %s1155_s18 = smov %s957_s19 }
 0x1b1   : > { %p15_p5 = scmp.ge.s32.totalorder %s18_s22, 4   ;;  %s1156_s19 = smov %s961_s20 }
 0x1b2   : > { %s1157_s20 = smov %s1064_s30  ;;  %s1158_s1 = smov %s969_s21 }
 0x1b3   : > { %s1159_s21 = smov %s1161_s25  ;;  %17 = sbr.rel (!%p15_p5) target bundleno = 4 (0x4), region = 95 }
 0x1ba   :  { %701 = vsyncpa [#allocation4], 1 }
 0x1bb   :  { %703 = vsyncpa [#allocation4 + $0x1], 1 }

</bundles_post_ra>
